<compile_context>
chip_gen: v7x
topology: tpu7x:2x2x1
jax: 0.10.0
libtpu: 0.0.40
codegen_flags: <defaults>
</compile_context>

<pallas_src>
import jax
import jax.numpy as jnp
from jax.experimental import pallas as pl
from jax.experimental.pallas import tpu as pltpu


def _head_kernel(x_ref, w1_ref, b1_ref, w2_ref, b2_ref, o_ref):
    # x: [rt, 128], w1: [128, 64], b1: [1, 64], w2: [64, C], b2: [1, C]
    # fc1: Linear(128 -> 64) + ReLU  (MXU matmul, f32 accumulate)
    h = jnp.dot(x_ref[...], w1_ref[...], preferred_element_type=jnp.float32)
    h = jnp.maximum(h + b1_ref[...], 0.0)        # bias broadcast + ReLU (VPU)

    # Dropout(p=0.3): identity in eval mode.

    # fc2: Linear(64 -> num_classes), narrow output stored directly (masked
    # store cost is irrelevant: the kernel is HBM-bound, store slots have slack).
    out = jnp.dot(h, w2_ref[...], preferred_element_type=jnp.float32)
    o_ref[...] = (out + b2_ref[...]).astype(o_ref.dtype)


def _round_up(a, m):
    return (a + m - 1) // m * m


def _choose_row_tile(B, row_tile):
    """Batch tile: multiple of 8, <= row_tile, and (when B is big enough)
    giving at least 2 grid steps so both v7x TensorCores get work."""
    if B <= 8:
        return 8
    n_tiles = max(2, pl.cdiv(B, row_tile))
    return min(_round_up(B, 8), _round_up(pl.cdiv(B, n_tiles), 8))


def classification_head(x, w1, b1, w2, b2, *, row_tile=4096):
    """x: [B, input_size] -> logits [B, num_classes] (float32).

    w1: [input_size, 64], b1: [64] or [1, 64], w2: [64, num_classes],
    b2: [num_classes] or [1, num_classes]  (i.e. x @ W + b, equivalent to
    PyTorch's x @ W.T with W stored [out, in]).
    """
    B, D = x.shape
    H = w1.shape[1]
    C = w2.shape[1]

    # Defensive reshape: accept PyTorch-style 1-D biases.
    b1 = jnp.reshape(b1, (1, H))
    b2 = jnp.reshape(b2, (1, C))

    rt = _choose_row_tile(B, row_tile)
    n_tiles = pl.cdiv(B, rt)

    out = pl.pallas_call(
        _head_kernel,
        out_shape=jax.ShapeDtypeStruct((B, C), jnp.float32),
        grid=(n_tiles,),
        in_specs=[
            pl.BlockSpec((rt, D), lambda i: (i, 0)),       # x: streamed per tile
            pl.BlockSpec(w1.shape, lambda i: (0, 0)),      # weights stay resident
            pl.BlockSpec((1, H), lambda i: (0, 0)),
            pl.BlockSpec(w2.shape, lambda i: (0, 0)),
            pl.BlockSpec((1, C), lambda i: (0, 0)),
        ],
        out_specs=pl.BlockSpec((rt, C), lambda i: (i, 0)),
        compiler_params=pltpu.CompilerParams(
            dimension_semantics=("parallel",),             # megacore on v7x
        ),
    )(x, w1, b1, w2, b2)

    return out


def init_params(key, input_size=128, hidden=64, num_classes=2):
    """Deterministic synthetic parameters (PyTorch-style uniform fan-in init)."""
    k1, k2, k3, k4 = jax.random.split(key, 4)
    bound1 = 1.0 / jnp.sqrt(input_size)
    bound2 = 1.0 / jnp.sqrt(hidden)
    w1 = jax.random.uniform(k1, (input_size, hidden), jnp.float32, -bound1, bound1)
    b1 = jax.random.uniform(k2, (hidden,), jnp.float32, -bound1, bound1)
    w2 = jax.random.uniform(k3, (hidden, num_classes), jnp.float32, -bound2, bound2)
    b2 = jax.random.uniform(k4, (num_classes,), jnp.float32, -bound2, bound2)
    return w1, b1, w2, b2


def _ref_forward(x, w1, b1, w2, b2):
    return jnp.maximum(x @ w1 + b1, 0.0) @ w2 + b2


if __name__ == "__main__":
    key = jax.random.PRNGKey(0)
    kx, kp, kx2 = jax.random.split(key, 3)

    INPUT_SIZE, HIDDEN, NUM_CLASSES = 128, 64, 2
    w1, b1, w2, b2 = init_params(kp, INPUT_SIZE, HIDDEN, NUM_CLASSES)

    # Small case (single tile, grid=1).
    B = 8
    x = jax.random.normal(kx, (B, INPUT_SIZE), jnp.float32)
    out = jax.block_until_ready(classification_head(x, w1, b1, w2, b2))
    ref = _ref_forward(x, w1, b1, w2, b2)
    assert out.shape == (B, NUM_CLASSES)
    assert out.dtype == jnp.float32
    assert jnp.allclose(out, ref, atol=1e-5, rtol=1e-5)

    # Larger case exercising a multi-step grid (both v7x cores) and the ragged
    # last tile (600 rows split into two 304-row blocks, edge writes masked).
    B2 = 600
    x2 = jax.random.normal(kx2, (B2, INPUT_SIZE), jnp.float32)
    out2 = jax.block_until_ready(classification_head(x2, w1, b1, w2, b2))
    ref2 = _ref_forward(x2, w1, b1, w2, b2)
    assert out2.shape == (B2, NUM_CLASSES)
    assert jnp.allclose(out2, ref2, atol=1e-5, rtol=1e-5)

    print("KERNEL_OK")
</pallas_src>

<mosaic_0001>
module attributes {stable_mosaic.version = 11 : i64} {
  func.func @_head_kernel(%arg0: i32, %arg1: memref<8x128xf32, #tpu.memory_space<vmem>>, %arg2: memref<128x64xf32, #tpu.memory_space<vmem>>, %arg3: memref<1x64xf32, #tpu.memory_space<vmem>>, %arg4: memref<64x2xf32, #tpu.memory_space<vmem>>, %arg5: memref<1x2xf32, #tpu.memory_space<vmem>>, %arg6: memref<8x2xf32, #tpu.memory_space<vmem>>) attributes {dimension_semantics = [#tpu.dimension_semantics<parallel>], iteration_bounds = array<i64: 1>, scalar_prefetch = 0 : i64, scratch_operands = 0 : i64, tpu.core_type = #tpu.core_type<tc>, window_params = [{transform_indices = @transform_0, window_bounds = array<i64: 8, 128>}, {pipeline_mode = #tpu.pipeline_mode<synchronous>, transform_indices = @transform_1, window_bounds = array<i64: 128, 64>}, {pipeline_mode = #tpu.pipeline_mode<synchronous>, transform_indices = @transform_2, window_bounds = array<i64: 1, 64>}, {pipeline_mode = #tpu.pipeline_mode<synchronous>, transform_indices = @transform_3, window_bounds = array<i64: 64, 2>}, {pipeline_mode = #tpu.pipeline_mode<synchronous>, transform_indices = @transform_4, window_bounds = array<i64: 1, 2>}, {transform_indices = @transform_5, window_bounds = array<i64: 8, 2>}]} {
    %c0 = arith.constant 0 : index
    %c0_0 = arith.constant 0 : index
    %0 = vector.load %arg1[%c0, %c0_0] : memref<8x128xf32, #tpu.memory_space<vmem>>, vector<8x128xf32>
    %c0_1 = arith.constant 0 : index
    %c0_2 = arith.constant 0 : index
    %1 = vector.load %arg2[%c0_1, %c0_2] : memref<128x64xf32, #tpu.memory_space<vmem>>, vector<128x64xf32>
    %cst = arith.constant dense<0.000000e+00> : vector<8x64xf32>
    %2 = tpu.matmul %0, %1, %cst {dimension_numbers = #tpu.dot_dimension_numbers<[1], [0], [0], [1], [0, 0, 1, 1], [], []>} : vector<8x128xf32>, vector<128x64xf32>, vector<8x64xf32> -> vector<8x64xf32>
    %c0_3 = arith.constant 0 : index
    %c0_4 = arith.constant 0 : index
    %3 = vector.load %arg3[%c0_3, %c0_4] : memref<1x64xf32, #tpu.memory_space<vmem>>, vector<1x64xf32>
    %4 = vector.broadcast %3 : vector<1x64xf32> to vector<8x64xf32>
    %5 = arith.addf %2, %4 : vector<8x64xf32>
    %cst_5 = arith.constant 0.000000e+00 : f32
    %6 = vector.broadcast %cst_5 : f32 to vector<8x64xf32>
    %7 = arith.maximumf %5, %6 : vector<8x64xf32>
    %c0_6 = arith.constant 0 : index
    %c0_7 = arith.constant 0 : index
    %8 = vector.load %arg4[%c0_6, %c0_7] : memref<64x2xf32, #tpu.memory_space<vmem>>, vector<64x2xf32>
    %cst_8 = arith.constant dense<0.000000e+00> : vector<8x2xf32>
    %9 = tpu.matmul %7, %8, %cst_8 {dimension_numbers = #tpu.dot_dimension_numbers<[1], [0], [0], [1], [0, 0, 1, 1], [], []>} : vector<8x64xf32>, vector<64x2xf32>, vector<8x2xf32> -> vector<8x2xf32>
    %c0_9 = arith.constant 0 : index
    %c0_10 = arith.constant 0 : index
    %10 = vector.load %arg5[%c0_9, %c0_10] : memref<1x2xf32, #tpu.memory_space<vmem>>, vector<1x2xf32>
    %11 = vector.broadcast %10 : vector<1x2xf32> to vector<8x2xf32>
    %12 = arith.addf %9, %11 : vector<8x2xf32>
    %c0_11 = arith.constant 0 : index
    %c0_12 = arith.constant 0 : index
    %13 = vector.load %arg6[%c0_11, %c0_12] : memref<8x2xf32, #tpu.memory_space<vmem>>, vector<8x2xf32>
    tpu.vector_store %arg6[%c0_11, %c0_12], %12 {strides = array<i32>} : memref<8x2xf32, #tpu.memory_space<vmem>>, vector<8x2xf32>,
    return
  }
  func.func @transform_0(%arg0: i32) -> (i32, i32) {
    %c0_i32 = arith.constant 0 : i32
    %c0_i32_0 = arith.constant 0 : i32
    return %arg0, %c0_i32 : i32, i32
  }
  func.func @transform_1(%arg0: i32) -> (i32, i32) {
    %c0_i32 = arith.constant 0 : i32
    %c0_i32_0 = arith.constant 0 : i32
    %c0_i32_1 = arith.constant 0 : i32
    return %c0_i32, %c0_i32_0 : i32, i32
  }
  func.func @transform_2(%arg0: i32) -> (i32, i32) {
    %c0_i32 = arith.constant 0 : i32
    %c0_i32_0 = arith.constant 0 : i32
    %c0_i32_1 = arith.constant 0 : i32
    return %c0_i32, %c0_i32_0 : i32, i32
  }
  func.func @transform_3(%arg0: i32) -> (i32, i32) {
    %c0_i32 = arith.constant 0 : i32
    %c0_i32_0 = arith.constant 0 : i32
    %c0_i32_1 = arith.constant 0 : i32
    return %c0_i32, %c0_i32_0 : i32, i32
  }
  func.func @transform_4(%arg0: i32) -> (i32, i32) {
    %c0_i32 = arith.constant 0 : i32
    %c0_i32_0 = arith.constant 0 : i32
    %c0_i32_1 = arith.constant 0 : i32
    return %c0_i32, %c0_i32_0 : i32, i32
  }
  func.func @transform_5(%arg0: i32) -> (i32, i32) {
    %c0_i32 = arith.constant 0 : i32
    %c0_i32_0 = arith.constant 0 : i32
    return %arg0, %c0_i32 : i32, i32
  }
}

</mosaic_0001>

<bundles_post_ra>
// kernel: tpu_custom_call.1
= control target key start
LH: loop header
LB: loop body
LE: loop exit
PB: predicated region body
PF: predicated region fallthrough
CT: control target
= control target key end

     0   :  { %v332_v0 = vmov 0.0|0.0   ;;  %vm333_vm0 = vmmov 0   ;;  %v334_v4 = vmov 0.0   ;;  %vm130_vm1 = vcmask 523264   ;;  %s449_s1 = inlined_call_operand.vmem [shape: f32[128,64], index: 1, kind: input, shape index: {}]   ;;  %s450_s3 = inlined_call_operand.vmem [shape: f32[64,2], index: 3, kind: input, shape index: {}]   ;;  %s451_s0 = inlined_call_operand.vmem [shape: f32[8,128], index: 0, kind: input, shape index: {}]   ;;  %s452_s2 = inlined_call_operand.vmem [shape: f32[1,64], index: 2, kind: input, shape index: {}]   ;;  %s453_s4 = inlined_call_operand.vmem [shape: f32[1,2], index: 4, kind: input, shape index: {}]   ;;  %s454_s5 = inlined_call_operand.vmem [shape: f32[8,2], index: 5, kind: output, shape index: {}]  }
   0x1   :  { %293 = vmatprep.subr.bf16.mxu0 %v332_v0  ;;  %v21_v1 = vld [vmem:[%s449_s1] sm:$0xff]  ;;  %v22_v2 = vld [vmem:[%s449_s1 + $0x8] sm:$0xff]  ;;  %v23_v3 = vld [vmem:[%s449_s1 + $0x10] sm:$0xff]  ;;  %271 = vmatprep.mubr.msk.f32.mxu0 %vm333_vm0, %v334_v4  ;;  %vm204_vm2 = vcmask 15360  }
   0x2   :  { %v294_v5 = vpack.c.bf16 %v22_v2, %v21_v1  ;;  %v24_v6 = vld [vmem:[%s449_s1 + $0x18] sm:$0xff]  ;;  %317 = vmatprep.subr.bf16.mxu1 %v332_v0  ;;  %290 = vmatprep.mubr.msk.f32.mxu1 %vm333_vm0, %v334_v4  ;;  %v25_v8 = vld [vmem:[%s449_s1 + $0x20] sm:$0xff]  ;;  %v26_v9 = vld [vmem:[%s449_s1 + $0x28] sm:$0xff] }
   0x3   :  { %v297_v7 = vpack.c.bf16 %v24_v6, %v23_v3  ;;  %v115_v10 = vld [vmem:[%s450_s3] sm:$0xff]  ;;  %v116_v11 = vld [vmem:[%s450_s3 + $0x8] sm:$0xff]  ;;  %v117_v12 = vld [vmem:[%s450_s3 + $0x10] sm:$0xff]  ;;  %v300_v14 = vpack.c.bf16 %v26_v9, %v25_v8 }
   0x4   :  { %295 = vmatpush3.bf16.msra.mxu0 %v294_v5  ;;  %v118_v13 = vld [vmem:[%s450_s3 + $0x18] sm:$0xff]  ;;  %v318_v15 = vpack.c.bf16 %v116_v11, %v115_v10  ;;  %v27_v16 = vld [vmem:[%s449_s1 + $0x30] sm:$0xff]  ;;  %v119_v19 = vld [vmem:[%s450_s3 + $0x20] sm:$0xff] }
   0x5   :  { %296 = vmatprep.subr.bf16.mxu0 %v332_v0  ;;  %v28_v17 = vld [vmem:[%s449_s1 + $0x38] sm:$0xff]  ;;  %v321_v18 = vpack.c.bf16 %v118_v13, %v117_v12  ;;  %v120_v20 = vld [vmem:[%s450_s3 + $0x28] sm:$0xff]  ;;  %v29_v22 = vld [vmem:[%s449_s1 + $0x40] sm:$0xff] }
   0x6   :  { %319 = vmatpush3.bf16.msra.mxu1 %v318_v15  ;;  %v303_v21 = vpack.c.bf16 %v28_v17, %v27_v16  ;;  %v30_v23 = vld [vmem:[%s449_s1 + $0x48] sm:$0xff]  ;;  %v324_v24 = vpack.c.bf16 %v120_v20, %v119_v19  ;;  %v31_v26 = vld [vmem:[%s449_s1 + $0x50] sm:$0xff]  ;;  %v32_v27 = vld [vmem:[%s449_s1 + $0x58] sm:$0xff] }
   0x7   :  { %320 = vmatprep.subr.bf16.mxu1 %v332_v0  ;;  %v306_v25 = vpack.c.bf16 %v30_v23, %v29_v22  ;;  %v309_v28 = vpack.c.bf16 %v32_v27, %v31_v26  ;;  %v33_v29 = vld [vmem:[%s449_s1 + $0x60] sm:$0xff]  ;;  %v34_v30 = vld [vmem:[%s449_s1 + $0x68] sm:$0xff]  ;;  %v35_v32 = vld [vmem:[%s449_s1 + $0x70] sm:$0xff] }
   0x8   :  { %298 = vmatpush3.bf16.msra.mxu0 %v297_v7  ;;  %v312_v31 = vpack.c.bf16 %v34_v30, %v33_v29  ;;  %v36_v33 = vld [vmem:[%s449_s1 + $0x78] sm:$0xff]  ;;  %v20_v35 = vld [vmem:[%s451_s0] sm:$0xff]  ;;  %v121_v36 = vld [vmem:[%s450_s3 + $0x30] sm:$0xff] }
   0x9   :  { %299 = vmatprep.subr.bf16.mxu0 %v332_v0  ;;  %v315_v34 = vpack.c.bf16 %v36_v33, %v35_v32  ;;  %v122_v37 = vld [vmem:[%s450_s3 + $0x38] sm:$0xff]  ;;  %v210_v39 = vld [vmem:[%s452_s2] ss:$0 sm:$0xff] }
   0xa   :  { %322 = vmatpush3.bf16.msra.mxu1 %v321_v18  ;;  %v327_v38 = vpack.c.bf16 %v122_v37, %v121_v36  ;;  %v211_v44 = vld [vmem:[%s453_s4] ss:$0 sm:$0xff] }
   0xb   :  { %323 = vmatprep.subr.bf16.mxu1 %v332_v0 }
   0xc   :  { %301 = vmatpush3.bf16.msra.mxu0 %v300_v14 }
   0xd   :  { %302 = vmatprep.subr.bf16.mxu0 %v332_v0 }
   0xe   :  { %325 = vmatpush3.bf16.msra.mxu1 %v324_v24 }
   0xf   :  { %326 = vmatprep.subr.bf16.mxu1 %v332_v0 }
  0x10   :  { %304 = vmatpush3.bf16.msra.mxu0 %v303_v21 }
  0x11   :  { %305 = vmatprep.subr.bf16.mxu0 %v332_v0 }
  0x12   :  { %328 = vmatpush3.bf16.msra.mxu1 %v327_v38 }
  0x14   :  { %307 = vmatpush3.bf16.msra.mxu0 %v306_v25 }
  0x15   :  { %308 = vmatprep.subr.bf16.mxu0 %v332_v0 }
  0x18   :  { %310 = vmatpush3.bf16.msra.mxu0 %v309_v28 }
  0x19   :  { %311 = vmatprep.subr.bf16.mxu0 %v332_v0 }
  0x1c   :  { %313 = vmatpush3.bf16.msra.mxu0 %v312_v31 }
  0x1d   :  { %314 = vmatprep.subr.bf16.mxu0 %v332_v0 }
  0x20   :  { %316 = vmatpush3.bf16.msra.mxu0 %v315_v34 }
  0x23   :  { %272 = vmatmul.mubr.f32.vlgmr.msra.gmra.mrb[0].mxu0 %v20_v35 }
  0xf6   :  { %v110_v40 = vpop.f32.mrb[0].mxu0 }
  0xf7   :  { %v111_v41 = vadd.f32 %v210_v39, %v110_v40  ;;  %v273_v42 = vpop.f32.mrb[1].mxu0 }
  0xf9   :  { %v114_v43 = vmax.f32 %v111_v41, 0.0 }
  0xfb   :  { %291 = vmatmul.mubr.msk.f32.vlgmr.msra.gmra.mrb[0].mxu1 %vm130_vm1, %v114_v43 }
 0x1ce   :  { %v200_v45 = vpop.f32.mrb[0].mxu1 }
 0x1cf   :  { %v201_v46 = vadd.f32 %v211_v44, %v200_v45  ;;  %v292_v47 = vpop.f32.mrb[1].mxu1 }
 0x1d1   :  { %205 = vst.msk [vmem:[%s454_s5] sm:$0xff] %vm204_vm2, %v201_v46 }

</bundles_post_ra>
